<compile_context>
chip_gen: v7x
topology: tpu7x:2x2x1
jax: 0.10.0
libtpu: 0.0.40
codegen_flags: <defaults>
</compile_context>

<pallas_src>
import jax
import jax.numpy as jnp
from jax.experimental import pallas as pl
from jax.experimental.pallas import tpu as pltpu


def _lstm_fused_kernel(x_ref, w_ih_t_ref, w_hh_t_ref, b_ref, w_lin_ref, b_lin_ref,
                       out_ref):
    """Fully-fused LSTM forward (input projection + recurrence + linear head).

    x_ref      : (T*B, I)  time-major flattened input (row = t*B + b)
    w_ih_t_ref : (I, 4H)   input->gates weights, pre-transposed
    w_hh_t_ref : (H, 4H)   hidden->gates weights, pre-transposed
    b_ref      : (1, 4H)   b_ih + b_hh
    w_lin_ref  : (O, H)    head weights (PyTorch orientation)
    b_lin_ref  : (1, O)    head bias
    out_ref    : (B, O)    predictions from the last time step
    """
    TB, _ = x_ref.shape
    H = w_hh_t_ref.shape[0]
    O = w_lin_ref.shape[0]
    B = out_ref.shape[0]
    T = TB // B

    # One-shot input projection for ALL time steps: a single MXU matmul off the serial
    # recurrence path.  Row t*B + b of gx holds x_{b,t} @ W_ih^T + b_ih + b_hh.
    gx = (jnp.dot(x_ref[...], w_ih_t_ref[...], preferred_element_type=jnp.float32)
          + b_ref[...])

    w_hh = w_hh_t_ref[...]                      # resident (H, 4H), loaded once

    h = jnp.zeros((B, H), jnp.float32)
    c = jnp.zeros((B, H), jnp.float32)

    # T is static (from shapes) and small -> fully unrolled Python loop.  Every gx slice
    # below is a static sublane slice, so the per-step serial path is just one small
    # MXU matmul + VPU/EUP elementwise work.
    # TODO(synk): for long sequences, switch to lax.fori_loop over a VMEM gx scratch.
    for t in range(T):
        gates = (gx[t * B:(t + 1) * B, :]
                 + jnp.dot(h, w_hh, preferred_element_type=jnp.float32))
        # Full-vreg EUP transcendentals, then static lane slices.
        # PyTorch gate ordering: i, f, g, o.
        sig = jax.nn.sigmoid(gates)
        th = jnp.tanh(gates)
        i_g = sig[:, 0 * H:1 * H]
        f_g = sig[:, 1 * H:2 * H]
        g_g = th[:, 2 * H:3 * H]
        o_g = sig[:, 3 * H:4 * H]
        c = f_g * c + i_g * g_g
        h = o_g * jnp.tanh(c)

    if O == 1:
        # VPU multiply + lane reduce: cheaper than an N=1 MXU matmul at the epilogue.
        out = jnp.sum(h * w_lin_ref[...], axis=-1, keepdims=True) + b_lin_ref[...]
    else:
        out = (jnp.dot(h, w_lin_ref[...].T, preferred_element_type=jnp.float32)
               + b_lin_ref[...])
    out_ref[...] = out.astype(out_ref.dtype)


@jax.jit
def lstm_model_forward(x_btI, w_ih, w_hh, b_ih, b_hh, w_lin, b_lin):
    """x_btI: (B, T, I) float32, batch_first — same semantics as the PyTorch module."""
    B, T, I = x_btI.shape
    four_h = w_ih.shape[0]
    H = four_h // 4
    O = w_lin.shape[0]
    del H  # only needed inside the kernel

    # Pure layout plumbing outside the kernel; all FLOPs happen inside the pallas_call.
    x_tb = jnp.transpose(x_btI, (1, 0, 2)).reshape(T * B, I)   # time-major, flat
    b_sum = (b_ih + b_hh).reshape(1, four_h)
    b_lin_r = b_lin.reshape(1, O)

    vmem = pl.BlockSpec(memory_space=pltpu.MemorySpace.VMEM)
    return pl.pallas_call(
        _lstm_fused_kernel,
        out_shape=jax.ShapeDtypeStruct((B, O), jnp.float32),
        in_specs=[vmem] * 6,
        out_specs=vmem,
    )(x_tb, w_ih.T, w_hh.T, b_sum, w_lin, b_lin_r)


def _reference_forward(x_btI, w_ih, w_hh, b_ih, b_hh, w_lin, b_lin):
    """Pure-JAX reference replicating nn.LSTM(batch_first=True) + Linear."""
    B, T, I = x_btI.shape
    H = w_hh.shape[1]

    def step(carry, x_t):
        h, c = carry
        gates = x_t @ w_ih.T + h @ w_hh.T + b_ih + b_hh
        i_g = jax.nn.sigmoid(gates[:, 0 * H:1 * H])
        f_g = jax.nn.sigmoid(gates[:, 1 * H:2 * H])
        g_g = jnp.tanh(gates[:, 2 * H:3 * H])
        o_g = jax.nn.sigmoid(gates[:, 3 * H:4 * H])
        c_new = f_g * c + i_g * g_g
        h_new = o_g * jnp.tanh(c_new)
        return (h_new, c_new), None

    h0 = jnp.zeros((B, H), jnp.float32)
    c0 = jnp.zeros((B, H), jnp.float32)
    (h_last, _), _ = jax.lax.scan(step, (h0, c0), jnp.transpose(x_btI, (1, 0, 2)))
    return h_last @ w_lin.T + b_lin


if __name__ == "__main__":
    # Small shapes consistent with the module (input_size=4, hidden=32, output=1).
    INPUT_SIZE = 4
    HIDDEN = 32
    OUTPUT = 1
    B, T = 2, 8

    key = jax.random.PRNGKey(0)
    k = jax.random.split(key, 7)
    bound = 1.0 / jnp.sqrt(HIDDEN)   # PyTorch default uniform init range

    w_ih = jax.random.uniform(k[0], (4 * HIDDEN, INPUT_SIZE), jnp.float32, -bound, bound)
    w_hh = jax.random.uniform(k[1], (4 * HIDDEN, HIDDEN), jnp.float32, -bound, bound)
    b_ih = jax.random.uniform(k[2], (4 * HIDDEN,), jnp.float32, -bound, bound)
    b_hh = jax.random.uniform(k[3], (4 * HIDDEN,), jnp.float32, -bound, bound)
    w_lin = jax.random.uniform(k[4], (OUTPUT, HIDDEN), jnp.float32, -bound, bound)
    b_lin = jax.random.uniform(k[5], (OUTPUT,), jnp.float32, -bound, bound)

    x = jax.random.normal(k[6], (B, T, INPUT_SIZE), jnp.float32)

    out = lstm_model_forward(x, w_ih, w_hh, b_ih, b_hh, w_lin, b_lin)
    out = jax.block_until_ready(out)

    ref = _reference_forward(x, w_ih, w_hh, b_ih, b_hh, w_lin, b_lin)
    assert out.shape == (B, OUTPUT), out.shape
    assert jnp.allclose(out, ref, rtol=1e-4, atol=1e-5), (out, ref)

    print("KERNEL_OK")
</pallas_src>

<mosaic_0001>
module attributes {stable_mosaic.version = 11 : i64} {
  func.func @_lstm_fused_kernel(%arg0: memref<16x4xf32, #tpu.memory_space<vmem>>, %arg1: memref<4x128xf32, #tpu.memory_space<vmem>>, %arg2: memref<32x128xf32, #tpu.memory_space<vmem>>, %arg3: memref<1x128xf32, #tpu.memory_space<vmem>>, %arg4: memref<1x32xf32, #tpu.memory_space<vmem>>, %arg5: memref<1x1xf32, #tpu.memory_space<vmem>>, %arg6: memref<2x1xf32, #tpu.memory_space<vmem>>) attributes {dimension_semantics = [], scalar_prefetch = 0 : i64, scratch_operands = 0 : i64, tpu.core_type = #tpu.core_type<tc>} {
    %c0 = arith.constant 0 : index
    %c0_0 = arith.constant 0 : index
    %0 = vector.load %arg0[%c0, %c0_0] : memref<16x4xf32, #tpu.memory_space<vmem>>, vector<16x4xf32>
    %c0_1 = arith.constant 0 : index
    %c0_2 = arith.constant 0 : index
    %1 = vector.load %arg1[%c0_1, %c0_2] : memref<4x128xf32, #tpu.memory_space<vmem>>, vector<4x128xf32>
    %cst = arith.constant dense<0.000000e+00> : vector<16x128xf32>
    %2 = tpu.matmul %0, %1, %cst {dimension_numbers = #tpu.dot_dimension_numbers<[1], [0], [0], [1], [0, 0, 1, 1], [], []>} : vector<16x4xf32>, vector<4x128xf32>, vector<16x128xf32> -> vector<16x128xf32>
    %c0_3 = arith.constant 0 : index
    %c0_4 = arith.constant 0 : index
    %3 = vector.load %arg3[%c0_3, %c0_4] : memref<1x128xf32, #tpu.memory_space<vmem>>, vector<1x128xf32>
    %4 = vector.broadcast %3 : vector<1x128xf32> to vector<16x128xf32>
    %5 = arith.addf %2, %4 : vector<16x128xf32>
    %c0_5 = arith.constant 0 : index
    %c0_6 = arith.constant 0 : index
    %6 = vector.load %arg2[%c0_5, %c0_6] : memref<32x128xf32, #tpu.memory_space<vmem>>, vector<32x128xf32>
    %cst_7 = arith.constant 0.000000e+00 : f32
    %7 = vector.broadcast %cst_7 : f32 to vector<2x32xf32>
    %cst_8 = arith.constant 0.000000e+00 : f32
    %8 = vector.broadcast %cst_8 : f32 to vector<2x32xf32>
    %9 = vector.extract_strided_slice %5 {offsets = [0, 0], sizes = [2, 128], strides = [1, 1]} : vector<16x128xf32> to vector<2x128xf32>
    %cst_9 = arith.constant dense<0.000000e+00> : vector<2x128xf32>
    %10 = tpu.matmul %7, %6, %cst_9 {dimension_numbers = #tpu.dot_dimension_numbers<[1], [0], [0], [1], [0, 0, 1, 1], [], []>} : vector<2x32xf32>, vector<32x128xf32>, vector<2x128xf32> -> vector<2x128xf32>
    %11 = arith.addf %9, %10 : vector<2x128xf32>
    %12 = arith.negf %11 : vector<2x128xf32>
    %13 = math.exp %12 : vector<2x128xf32>
    %cst_10 = arith.constant 1.000000e+00 : f32
    %14 = vector.broadcast %cst_10 : f32 to vector<2x128xf32>
    %15 = arith.addf %14, %13 : vector<2x128xf32>
    %16 = arith.divf %14, %15 : vector<2x128xf32>
    %17 = math.tanh %11 : vector<2x128xf32>
    %18 = vector.extract_strided_slice %16 {offsets = [0, 0], sizes = [2, 32], strides = [1, 1]} : vector<2x128xf32> to vector<2x32xf32>
    %19 = vector.extract_strided_slice %16 {offsets = [0, 32], sizes = [2, 32], strides = [1, 1]} : vector<2x128xf32> to vector<2x32xf32>
    %20 = vector.extract_strided_slice %17 {offsets = [0, 64], sizes = [2, 32], strides = [1, 1]} : vector<2x128xf32> to vector<2x32xf32>
    %21 = vector.extract_strided_slice %16 {offsets = [0, 96], sizes = [2, 32], strides = [1, 1]} : vector<2x128xf32> to vector<2x32xf32>
    %22 = arith.mulf %19, %8 : vector<2x32xf32>
    %23 = arith.mulf %18, %20 : vector<2x32xf32>
    %24 = arith.addf %22, %23 : vector<2x32xf32>
    %25 = math.tanh %24 : vector<2x32xf32>
    %26 = arith.mulf %21, %25 : vector<2x32xf32>
    %27 = vector.extract_strided_slice %5 {offsets = [2, 0], sizes = [2, 128], strides = [1, 1]} : vector<16x128xf32> to vector<2x128xf32>
    %cst_11 = arith.constant dense<0.000000e+00> : vector<2x128xf32>
    %28 = tpu.matmul %26, %6, %cst_11 {dimension_numbers = #tpu.dot_dimension_numbers<[1], [0], [0], [1], [0, 0, 1, 1], [], []>} : vector<2x32xf32>, vector<32x128xf32>, vector<2x128xf32> -> vector<2x128xf32>
    %29 = arith.addf %27, %28 : vector<2x128xf32>
    %30 = arith.negf %29 : vector<2x128xf32>
    %31 = math.exp %30 : vector<2x128xf32>
    %cst_12 = arith.constant 1.000000e+00 : f32
    %32 = vector.broadcast %cst_12 : f32 to vector<2x128xf32>
    %33 = arith.addf %32, %31 : vector<2x128xf32>
    %34 = arith.divf %32, %33 : vector<2x128xf32>
    %35 = math.tanh %29 : vector<2x128xf32>
    %36 = vector.extract_strided_slice %34 {offsets = [0, 0], sizes = [2, 32], strides = [1, 1]} : vector<2x128xf32> to vector<2x32xf32>
    %37 = vector.extract_strided_slice %34 {offsets = [0, 32], sizes = [2, 32], strides = [1, 1]} : vector<2x128xf32> to vector<2x32xf32>
    %38 = vector.extract_strided_slice %35 {offsets = [0, 64], sizes = [2, 32], strides = [1, 1]} : vector<2x128xf32> to vector<2x32xf32>
    %39 = vector.extract_strided_slice %34 {offsets = [0, 96], sizes = [2, 32], strides = [1, 1]} : vector<2x128xf32> to vector<2x32xf32>
    %40 = arith.mulf %37, %24 : vector<2x32xf32>
    %41 = arith.mulf %36, %38 : vector<2x32xf32>
    %42 = arith.addf %40, %41 : vector<2x32xf32>
    %43 = math.tanh %42 : vector<2x32xf32>
    %44 = arith.mulf %39, %43 : vector<2x32xf32>
    %45 = vector.extract_strided_slice %5 {offsets = [4, 0], sizes = [2, 128], strides = [1, 1]} : vector<16x128xf32> to vector<2x128xf32>
    %cst_13 = arith.constant dense<0.000000e+00> : vector<2x128xf32>
    %46 = tpu.matmul %44, %6, %cst_13 {dimension_numbers = #tpu.dot_dimension_numbers<[1], [0], [0], [1], [0, 0, 1, 1], [], []>} : vector<2x32xf32>, vector<32x128xf32>, vector<2x128xf32> -> vector<2x128xf32>
    %47 = arith.addf %45, %46 : vector<2x128xf32>
    %48 = arith.negf %47 : vector<2x128xf32>
    %49 = math.exp %48 : vector<2x128xf32>
    %cst_14 = arith.constant 1.000000e+00 : f32
    %50 = vector.broadcast %cst_14 : f32 to vector<2x128xf32>
    %51 = arith.addf %50, %49 : vector<2x128xf32>
    %52 = arith.divf %50, %51 : vector<2x128xf32>
    %53 = math.tanh %47 : vector<2x128xf32>
    %54 = vector.extract_strided_slice %52 {offsets = [0, 0], sizes = [2, 32], strides = [1, 1]} : vector<2x128xf32> to vector<2x32xf32>
    %55 = vector.extract_strided_slice %52 {offsets = [0, 32], sizes = [2, 32], strides = [1, 1]} : vector<2x128xf32> to vector<2x32xf32>
    %56 = vector.extract_strided_slice %53 {offsets = [0, 64], sizes = [2, 32], strides = [1, 1]} : vector<2x128xf32> to vector<2x32xf32>
    %57 = vector.extract_strided_slice %52 {offsets = [0, 96], sizes = [2, 32], strides = [1, 1]} : vector<2x128xf32> to vector<2x32xf32>
    %58 = arith.mulf %55, %42 : vector<2x32xf32>
    %59 = arith.mulf %54, %56 : vector<2x32xf32>
    %60 = arith.addf %58, %59 : vector<2x32xf32>
    %61 = math.tanh %60 : vector<2x32xf32>
    %62 = arith.mulf %57, %61 : vector<2x32xf32>
    %63 = vector.extract_strided_slice %5 {offsets = [6, 0], sizes = [2, 128], strides = [1, 1]} : vector<16x128xf32> to vector<2x128xf32>
    %cst_15 = arith.constant dense<0.000000e+00> : vector<2x128xf32>
    %64 = tpu.matmul %62, %6, %cst_15 {dimension_numbers = #tpu.dot_dimension_numbers<[1], [0], [0], [1], [0, 0, 1, 1], [], []>} : vector<2x32xf32>, vector<32x128xf32>, vector<2x128xf32> -> vector<2x128xf32>
    %65 = arith.addf %63, %64 : vector<2x128xf32>
    %66 = arith.negf %65 : vector<2x128xf32>
    %67 = math.exp %66 : vector<2x128xf32>
    %cst_16 = arith.constant 1.000000e+00 : f32
    %68 = vector.broadcast %cst_16 : f32 to vector<2x128xf32>
    %69 = arith.addf %68, %67 : vector<2x128xf32>
    %70 = arith.divf %68, %69 : vector<2x128xf32>
    %71 = math.tanh %65 : vector<2x128xf32>
    %72 = vector.extract_strided_slice %70 {offsets = [0, 0], sizes = [2, 32], strides = [1, 1]} : vector<2x128xf32> to vector<2x32xf32>
    %73 = vector.extract_strided_slice %70 {offsets = [0, 32], sizes = [2, 32], strides = [1, 1]} : vector<2x128xf32> to vector<2x32xf32>
    %74 = vector.extract_strided_slice %71 {offsets = [0, 64], sizes = [2, 32], strides = [1, 1]} : vector<2x128xf32> to vector<2x32xf32>
    %75 = vector.extract_strided_slice %70 {offsets = [0, 96], sizes = [2, 32], strides = [1, 1]} : vector<2x128xf32> to vector<2x32xf32>
    %76 = arith.mulf %73, %60 : vector<2x32xf32>
    %77 = arith.mulf %72, %74 : vector<2x32xf32>
    %78 = arith.addf %76, %77 : vector<2x32xf32>
    %79 = math.tanh %78 : vector<2x32xf32>
    %80 = arith.mulf %75, %79 : vector<2x32xf32>
    %81 = vector.extract_strided_slice %5 {offsets = [8, 0], sizes = [2, 128], strides = [1, 1]} : vector<16x128xf32> to vector<2x128xf32>
    %cst_17 = arith.constant dense<0.000000e+00> : vector<2x128xf32>
    %82 = tpu.matmul %80, %6, %cst_17 {dimension_numbers = #tpu.dot_dimension_numbers<[1], [0], [0], [1], [0, 0, 1, 1], [], []>} : vector<2x32xf32>, vector<32x128xf32>, vector<2x128xf32> -> vector<2x128xf32>
    %83 = arith.addf %81, %82 : vector<2x128xf32>
    %84 = arith.negf %83 : vector<2x128xf32>
    %85 = math.exp %84 : vector<2x128xf32>
    %cst_18 = arith.constant 1.000000e+00 : f32
    %86 = vector.broadcast %cst_18 : f32 to vector<2x128xf32>
    %87 = arith.addf %86, %85 : vector<2x128xf32>
    %88 = arith.divf %86, %87 : vector<2x128xf32>
    %89 = math.tanh %83 : vector<2x128xf32>
    %90 = vector.extract_strided_slice %88 {offsets = [0, 0], sizes = [2, 32], strides = [1, 1]} : vector<2x128xf32> to vector<2x32xf32>
    %91 = vector.extract_strided_slice %88 {offsets = [0, 32], sizes = [2, 32], strides = [1, 1]} : vector<2x128xf32> to vector<2x32xf32>
    %92 = vector.extract_strided_slice %89 {offsets = [0, 64], sizes = [2, 32], strides = [1, 1]} : vector<2x128xf32> to vector<2x32xf32>
    %93 = vector.extract_strided_slice %88 {offsets = [0, 96], sizes = [2, 32], strides = [1, 1]} : vector<2x128xf32> to vector<2x32xf32>
    %94 = arith.mulf %91, %78 : vector<2x32xf32>
    %95 = arith.mulf %90, %92 : vector<2x32xf32>
    %96 = arith.addf %94, %95 : vector<2x32xf32>
    %97 = math.tanh %96 : vector<2x32xf32>
    %98 = arith.mulf %93, %97 : vector<2x32xf32>
    %99 = vector.extract_strided_slice %5 {offsets = [10, 0], sizes = [2, 128], strides = [1, 1]} : vector<16x128xf32> to vector<2x128xf32>
    %cst_19 = arith.constant dense<0.000000e+00> : vector<2x128xf32>
    %100 = tpu.matmul %98, %6, %cst_19 {dimension_numbers = #tpu.dot_dimension_numbers<[1], [0], [0], [1], [0, 0, 1, 1], [], []>} : vector<2x32xf32>, vector<32x128xf32>, vector<2x128xf32> -> vector<2x128xf32>
    %101 = arith.addf %99, %100 : vector<2x128xf32>
    %102 = arith.negf %101 : vector<2x128xf32>
    %103 = math.exp %102 : vector<2x128xf32>
    %cst_20 = arith.constant 1.000000e+00 : f32
    %104 = vector.broadcast %cst_20 : f32 to vector<2x128xf32>
    %105 = arith.addf %104, %103 : vector<2x128xf32>
    %106 = arith.divf %104, %105 : vector<2x128xf32>
    %107 = math.tanh %101 : vector<2x128xf32>
    %108 = vector.extract_strided_slice %106 {offsets = [0, 0], sizes = [2, 32], strides = [1, 1]} : vector<2x128xf32> to vector<2x32xf32>
    %109 = vector.extract_strided_slice %106 {offsets = [0, 32], sizes = [2, 32], strides = [1, 1]} : vector<2x128xf32> to vector<2x32xf32>
    %110 = vector.extract_strided_slice %107 {offsets = [0, 64], sizes = [2, 32], strides = [1, 1]} : vector<2x128xf32> to vector<2x32xf32>
    %111 = vector.extract_strided_slice %106 {offsets = [0, 96], sizes = [2, 32], strides = [1, 1]} : vector<2x128xf32> to vector<2x32xf32>
    %112 = arith.mulf %109, %96 : vector<2x32xf32>
    %113 = arith.mulf %108, %110 : vector<2x32xf32>
    %114 = arith.addf %112, %113 : vector<2x32xf32>
    %115 = math.tanh %114 : vector<2x32xf32>
    %116 = arith.mulf %111, %115 : vector<2x32xf32>
    %117 = vector.extract_strided_slice %5 {offsets = [12, 0], sizes = [2, 128], strides = [1, 1]} : vector<16x128xf32> to vector<2x128xf32>
    %cst_21 = arith.constant dense<0.000000e+00> : vector<2x128xf32>
    %118 = tpu.matmul %116, %6, %cst_21 {dimension_numbers = #tpu.dot_dimension_numbers<[1], [0], [0], [1], [0, 0, 1, 1], [], []>} : vector<2x32xf32>, vector<32x128xf32>, vector<2x128xf32> -> vector<2x128xf32>
    %119 = arith.addf %117, %118 : vector<2x128xf32>
    %120 = arith.negf %119 : vector<2x128xf32>
    %121 = math.exp %120 : vector<2x128xf32>
    %cst_22 = arith.constant 1.000000e+00 : f32
    %122 = vector.broadcast %cst_22 : f32 to vector<2x128xf32>
    %123 = arith.addf %122, %121 : vector<2x128xf32>
    %124 = arith.divf %122, %123 : vector<2x128xf32>
    %125 = math.tanh %119 : vector<2x128xf32>
    %126 = vector.extract_strided_slice %124 {offsets = [0, 0], sizes = [2, 32], strides = [1, 1]} : vector<2x128xf32> to vector<2x32xf32>
    %127 = vector.extract_strided_slice %124 {offsets = [0, 32], sizes = [2, 32], strides = [1, 1]} : vector<2x128xf32> to vector<2x32xf32>
    %128 = vector.extract_strided_slice %125 {offsets = [0, 64], sizes = [2, 32], strides = [1, 1]} : vector<2x128xf32> to vector<2x32xf32>
    %129 = vector.extract_strided_slice %124 {offsets = [0, 96], sizes = [2, 32], strides = [1, 1]} : vector<2x128xf32> to vector<2x32xf32>
    %130 = arith.mulf %127, %114 : vector<2x32xf32>
    %131 = arith.mulf %126, %128 : vector<2x32xf32>
    %132 = arith.addf %130, %131 : vector<2x32xf32>
    %133 = math.tanh %132 : vector<2x32xf32>
    %134 = arith.mulf %129, %133 : vector<2x32xf32>
    %135 = vector.extract_strided_slice %5 {offsets = [14, 0], sizes = [2, 128], strides = [1, 1]} : vector<16x128xf32> to vector<2x128xf32>
    %cst_23 = arith.constant dense<0.000000e+00> : vector<2x128xf32>
    %136 = tpu.matmul %134, %6, %cst_23 {dimension_numbers = #tpu.dot_dimension_numbers<[1], [0], [0], [1], [0, 0, 1, 1], [], []>} : vector<2x32xf32>, vector<32x128xf32>, vector<2x128xf32> -> vector<2x128xf32>
    %137 = arith.addf %135, %136 : vector<2x128xf32>
    %138 = arith.negf %137 : vector<2x128xf32>
    %139 = math.exp %138 : vector<2x128xf32>
    %cst_24 = arith.constant 1.000000e+00 : f32
    %140 = vector.broadcast %cst_24 : f32 to vector<2x128xf32>
    %141 = arith.addf %140, %139 : vector<2x128xf32>
    %142 = arith.divf %140, %141 : vector<2x128xf32>
    %143 = math.tanh %137 : vector<2x128xf32>
    %144 = vector.extract_strided_slice %142 {offsets = [0, 0], sizes = [2, 32], strides = [1, 1]} : vector<2x128xf32> to vector<2x32xf32>
    %145 = vector.extract_strided_slice %142 {offsets = [0, 32], sizes = [2, 32], strides = [1, 1]} : vector<2x128xf32> to vector<2x32xf32>
    %146 = vector.extract_strided_slice %143 {offsets = [0, 64], sizes = [2, 32], strides = [1, 1]} : vector<2x128xf32> to vector<2x32xf32>
    %147 = vector.extract_strided_slice %142 {offsets = [0, 96], sizes = [2, 32], strides = [1, 1]} : vector<2x128xf32> to vector<2x32xf32>
    %148 = arith.mulf %145, %132 : vector<2x32xf32>
    %149 = arith.mulf %144, %146 : vector<2x32xf32>
    %150 = arith.addf %148, %149 : vector<2x32xf32>
    %151 = math.tanh %150 : vector<2x32xf32>
    %152 = arith.mulf %147, %151 : vector<2x32xf32>
    %c0_25 = arith.constant 0 : index
    %c0_26 = arith.constant 0 : index
    %153 = vector.load %arg4[%c0_25, %c0_26] : memref<1x32xf32, #tpu.memory_space<vmem>>, vector<1x32xf32>
    %154 = vector.broadcast %153 : vector<1x32xf32> to vector<2x32xf32>
    %155 = arith.mulf %152, %154 : vector<2x32xf32>
    %cst_27 = arith.constant dense<0.000000e+00> : vector<2xf32>
    %156 = vector.multi_reduction <add>, %155, %cst_27 [1] : vector<2x32xf32> to vector<2xf32>
    %157 = vector.shape_cast %156 : vector<2xf32> to vector<2x1xf32>
    %c0_28 = arith.constant 0 : index
    %c0_29 = arith.constant 0 : index
    %158 = vector.load %arg5[%c0_28, %c0_29] : memref<1x1xf32, #tpu.memory_space<vmem>>, vector<1x1xf32>
    %159 = vector.broadcast %158 : vector<1x1xf32> to vector<2x1xf32>
    %160 = arith.addf %157, %159 : vector<2x1xf32>
    %c0_30 = arith.constant 0 : index
    %c0_31 = arith.constant 0 : index
    %161 = vector.load %arg6[%c0_30, %c0_31] : memref<2x1xf32, #tpu.memory_space<vmem>>, vector<2x1xf32>
    tpu.vector_store %arg6[%c0_30, %c0_31], %160 {strides = array<i32>} : memref<2x1xf32, #tpu.memory_space<vmem>>, vector<2x1xf32>,
    return
  }
}

</mosaic_0001>

<bundles_post_ra>
// kernel: lstm_model_forward.1
= control target key start
LH: loop header
LB: loop body
LE: loop exit
PB: predicated region body
PF: predicated region fallthrough
CT: control target
= control target key end

     0   :  { %vm42_vm0 = vcmask 1043456   ;;  %vm35_vm1 = vcmask 31744   ;;  %v1275_v0 = vmov 0.0|0.0   ;;  %vm1276_vm2 = vmmov 0   ;;  %s1278_s10 = smov 64   ;;  %s1280_s13 = smov 96   ;;  %s1457_s2 = inlined_call_operand.vmem [shape: f32[32,128], index: 2, kind: input, shape index: {}]   ;;  %s1458_s1 = inlined_call_operand.vmem [shape: f32[4,128], index: 1, kind: input, shape index: {}]   ;;  %s1459_s0 = inlined_call_operand.vmem [shape: f32[16,4], index: 0, kind: input, shape index: {}]   ;;  %s1460_s3 = inlined_call_operand.vmem [shape: f32[1,128], index: 3, kind: input, shape index: {}]   ;;  %s1461_s4 = inlined_call_operand.vmem [shape: f32[1,32], index: 4, kind: input, shape index: {}]   ;;  %s1462_s5 = inlined_call_operand.<no memory space> [shape: f32[1,1], index: 5, kind: input, shape index: {}]   ;;  %s1463_s6 = inlined_call_operand.vmem [shape: f32[2,1], index: 6, kind: output, shape index: {}]  }
   0x1   :  { %1157 = vmatprep.subr.bf16.mxu1 %v1275_v0  ;;  %v121_v1 = vld [vmem:[%s1457_s2] sm:$0xff]  ;;  %v122_v2 = vld [vmem:[%s1457_s2 + $0x8] sm:$0xff]  ;;  %v123_v7 = vld [vmem:[%s1457_s2 + $0x10] sm:$0xff]  ;;  %v1277_v8 = vmov 0.0   ;;  %vm125_vm3 = vcmask 261120   ;;  %vm982_vm4 = vcmask 261126  }
   0x2   :  { %v27_v3 = vld [vmem:[%s1458_s1] sm:$0xf]  ;;  %v1326_v4 = vpack.c.bf16 %v122_v2, %v121_v1  ;;  %v26_v6 = vld [vmem:[%s1459_s0 + $0x8] sm:$0xff]  ;;  %1077 = vmatprep.mubr.msk.f32.mxu1 %vm1276_vm2, %v1277_v8  ;;  %v124_v9 = vld [vmem:[%s1457_s2 + $0x18] sm:$0xff]  ;;  %vm994_vm5 = vcmask 7174  }
   0x3   :  { %1064 = vmatprep.subr.msk.mxu0 %vm42_vm0, %v27_v3  ;;  %v25_v5 = vld [vmem:[%s1459_s0] sm:$0xff]  ;;  %v1347_v10 = vpack.c.bf16 %v124_v9, %v123_v7 }
   0x4   :  { %1065 = vmatpush3.msk.msra.mxu0 %vm42_vm0, %v27_v3  ;;  %1066 = vmatprep.mubr.msk.f32.mxu0 %vm35_vm1, %v25_v5  ;;  %v1000_v11 = vld [vmem:[%s1460_s3] ss:$0 sm:$0xff]  ;;  %s1279_s3 = smov 32  }
   0x5   :  { %1159 = vmatpush3.bf16.msra.mxu1 %v1326_v4  ;;  %1067 = vmatmul.mubr.msk.f32.vlgmr.msra.gmra.mrb[0].mxu0 %vm35_vm1, %v26_v6 }
   0x6   :  { %1160 = vmatprep.subr.bf16.mxu1 %v1275_v0  ;;  %1163 = vmatprep.subr.bf16.mxu0 %v1275_v0 }
   0x7   :  { %1165 = vmatpush3.bf16.msra.mxu0 %v1326_v4  ;;  %1088 = vmatprep.mubr.msk.f32.mxu0 %vm1276_vm2, %v1277_v8 }
   0x8   :  { %1166 = vmatprep.subr.bf16.mxu0 %v1275_v0 }
   0x9   :  { %1162 = vmatpush3.bf16.msra.mxu1 %v1347_v10 }
   0xa   :  { %1169 = vmatprep.subr.bf16.mxu1 %v1275_v0 }
   0xb   :  { %1168 = vmatpush3.bf16.msra.mxu0 %v1347_v10 }
   0xc   :  { %1078 = vmatmul.mubr.f32.vlgmr.msra.gmra.mrb[0].mxu1 %v1277_v8  ;;  %1175 = vmatprep.subr.bf16.mxu0 %v1275_v0 }
   0xd   :  { %1171 = vmatpush3.bf16.msra.mxu1 %v1326_v4  ;;  %1099 = vmatprep.mubr.msk.f32.mxu1 %vm1276_vm2, %v1277_v8 }
   0xe   :  { %1172 = vmatprep.subr.bf16.mxu1 %v1275_v0 }
  0x11   :  { %1174 = vmatpush3.bf16.msra.mxu1 %v1347_v10 }
  0x12   :  { %1181 = vmatprep.subr.bf16.mxu1 %v1275_v0 }
  0xd8   :  { %v1068_v12 = vpop.f32.mrb[0].mxu0 }
  0xd9   :  { %v1369_v13 = vadd.f32 %v1068_v12, %v1000_v11  ;;  %v112_v14 = vpop.f32.mrb[1].mxu0 }
  0xda   :  { %v1371_v15 = vadd.f32 %v1000_v11, %v112_v14 }
  0xdf   :  { %v195_v16 = vpop.f32.mrb[0].mxu1 }
  0xe0   :  { %v199_v17 = vadd.f32 %v195_v16, %v1371_v15  ;;  %v1079_v18 = vpop.f32.mrb[1].mxu1 }
  0xe2   :  { %1211 = vtanh.f32 %v199_v17  ;;  %v1004_v20 = vmul.f32 -1.442695, %v199_v17 }
  0xe4   :  { %1213 = vpow2.f32 %v1004_v20 }
  0xec   :  { %v1212_v19 = vpop.eup %1211 }
  0xed   :  { %209 = vrot.lane.b32.xlu0 %v1212_v19, %s1278_s10 }
  0xee   :  { %v1214_v21 = vpop.eup %1213 }
  0xef   :  { %v203_v22 = vadd.f32 1.0, %v1214_v21 }
  0xf1   :  { %1215 = vrcp.f32 %v203_v22 }
  0xfb   :  { %v1216_v23 = vpop.eup %1215 }
  0xfc   :  { %v207_v26 = vmul.f32 0.0, %v1216_v23 }
 0x15f   :  { %v210_v24 = vpop.permute.xlu0 %209 }
 0x160   :  { %v212_v25 = vmul.f32 %v1216_v23, %v210_v24 }
 0x162   :  { %214 = vrot.lane.b32.xlu0 %v212_v25, %s1279_s3 }
 0x1d4   :  { %v215_v27 = vpop.permute.xlu0 %214 }
 0x1d5   :  { %v217_v28 = vadd.f32 %v215_v27, %v207_v26 }
 0x1d7   :  { %1217 = vtanh.f32 %v217_v28  ;;  %v311_v44 = vrot.slane %v217_v28, 6 }
 0x1e1   :  { %v1218_v29 = vpop.eup %1217 }
 0x1e2   :  { %220 = vrot.lane.b32.xlu1 %v1218_v29, %s1278_s10 }
 0x254   :  { %v221_v30 = vpop.permute.xlu1 %220 }
 0x255   :  { %v223_v31 = vmul.f32 %v1216_v23, %v221_v30 }
 0x257   :  { %225 = vrot.lane.b32.xlu1 %v223_v31, %s1279_s3 }
 0x2c9   :  { %v226_v32 = vpop.permute.xlu1 %225 }
 0x2ca   :  { %1089 = vmatmul.mubr.msk.f32.vlgmr.msra.gmra.mrb[2].mxu0 %vm125_vm3, %v226_v32 }
 0x2cb   :  { %1177 = vmatpush3.bf16.msra.mxu0 %v1326_v4  ;;  %1110 = vmatprep.mubr.msk.f32.mxu0 %vm1276_vm2, %v1277_v8 }
 0x2cc   :  { %1178 = vmatprep.subr.bf16.mxu0 %v1275_v0 }
 0x2cf   :  { %1180 = vmatpush3.bf16.msra.mxu0 %v1347_v10 }
 0x2d0   :  { %1187 = vmatprep.subr.bf16.mxu0 %v1275_v0 }
 0x39d   :  { %v295_v33 = vpop.f32.mrb[2].mxu0 }
 0x39e   :  { %v300_v34 = vrot.slane %v295_v33, 6  ;;  %v1090_v35 = vpop.f32.mrb[3].mxu0 }
 0x3a0   :  { %v302_v36 = vadd.f32 %v300_v34, %v1371_v15 }
 0x3a2   :  { %1219 = vtanh.f32 %v302_v36  ;;  %v1006_v38 = vmul.f32 -1.442695, %v302_v36 }
 0x3a4   :  { %1221 = vpow2.f32 %v1006_v38 }
 0x3ac   :  { %v1220_v37 = vpop.eup %1219 }
 0x3ad   :  { %315 = vrot.lane.b32.xlu0 %v1220_v37, %s1278_s10 }
 0x3ae   :  { %v1222_v39 = vpop.eup %1221 }
 0x3af   :  { %v306_v40 = vadd.f32 1.0, %v1222_v39 }
 0x3b1   :  { %1223 = vrcp.f32 %v306_v40 }
 0x3bb   :  { %v1224_v41 = vpop.eup %1223 }
 0x3bc   :  { %v313_v45 = vmul.f32 %v1224_v41, %v311_v44 }
 0x41f   :  { %v316_v42 = vpop.permute.xlu0 %315 }
 0x420   :  { %v318_v43 = vmul.f32 %v1224_v41, %v316_v42 }
 0x422   :  { %320 = vrot.lane.b32.xlu1 %v318_v43, %s1279_s3 }
 0x494   :  { %v321_v46 = vpop.permute.xlu1 %320 }
 0x495   :  { %v323_v47 = vadd.f32 %v321_v46, %v313_v45 }
 0x497   :  { %1225 = vtanh.f32 %v323_v47  ;;  %v418_v1 = vrot.slane %v323_v47, 6 }
 0x4a1   :  { %v1226_v48 = vpop.eup %1225 }
 0x4a2   :  { %326 = vrot.lane.b32.xlu0 %v1226_v48, %s1278_s10 }
 0x514   :  { %v327_v49 = vpop.permute.xlu0 %326 }
 0x515   :  { %v329_v50 = vmul.f32 %v1224_v41, %v327_v49 }
 0x517   :  { %v331_v51 = vrot.slane %v329_v50, 2 }
 0x519   :  { %332 = vrot.lane.b32.xlu1 %v331_v51, %s1279_s3 }
 0x58b   :  { %v333_v52 = vpop.permute.xlu1 %332 }
 0x58c   :  { %1100 = vmatmul.mubr.msk.f32.vlgmr.msra.gmra.mrb[2].mxu1 %vm125_vm3, %v333_v52 }
 0x58d   :  { %1183 = vmatpush3.bf16.msra.mxu1 %v1326_v4  ;;  %1121 = vmatprep.mubr.msk.f32.mxu1 %vm1276_vm2, %v1277_v8 }
 0x58e   :  { %1184 = vmatprep.subr.bf16.mxu1 %v1275_v0 }
 0x591   :  { %1186 = vmatpush3.bf16.msra.mxu1 %v1347_v10 }
 0x592   :  { %1193 = vmatprep.subr.bf16.mxu1 %v1275_v0 }
 0x65f   :  { %v402_v53 = vpop.f32.mrb[2].mxu1 }
 0x660   :  { %v407_v54 = vrot.slane %v402_v53, 4  ;;  %v1101_v55 = vpop.f32.mrb[3].mxu1 }
 0x662   :  { %v409_v56 = vadd.f32 %v407_v54, %v1371_v15 }
 0x664   :  { %1227 = vtanh.f32 %v409_v56  ;;  %v1008_v58 = vmul.f32 -1.442695, %v409_v56 }
 0x666   :  { %1229 = vpow2.f32 %v1008_v58 }
 0x66e   :  { %v1228_v57 = vpop.eup %1227 }
 0x66f   :  { %422 = vrot.lane.b32.xlu0 %v1228_v57, %s1278_s10 }
 0x670   :  { %v1230_v59 = vpop.eup %1229 }
 0x671   :  { %v413_v60 = vadd.f32 1.0, %v1230_v59 }
 0x673   :  { %1231 = vrcp.f32 %v413_v60 }
 0x67d   :  { %v1232_v61 = vpop.eup %1231 }
 0x67e   :  { %v420_v2 = vmul.f32 %v1232_v61, %v418_v1 }
 0x6e1   :  { %v423_v62 = vpop.permute.xlu0 %422 }
 0x6e2   :  { %v425_v63 = vmul.f32 %v1232_v61, %v423_v62 }
 0x6e4   :  { %427 = vrot.lane.b32.xlu1 %v425_v63, %s1279_s3 }
 0x756   :  { %v428_v3 = vpop.permute.xlu1 %427 }
 0x757   :  { %v430_v5 = vadd.f32 %v428_v3, %v420_v2 }
 0x759   :  { %1233 = vtanh.f32 %v430_v5  ;;  %v525_v26 = vrot.slane %v430_v5, 6 }
 0x763   :  { %v1234_v6 = vpop.eup %1233 }
 0x764   :  { %433 = vrot.lane.b32.xlu0 %v1234_v6, %s1278_s10 }
 0x7d6   :  { %v434_v7 = vpop.permute.xlu0 %433 }
 0x7d7   :  { %v436_v9 = vmul.f32 %v1232_v61, %v434_v7 }
 0x7d9   :  { %v438_v11 = vrot.slane %v436_v9, 4 }
 0x7db   :  { %439 = vrot.lane.b32.xlu1 %v438_v11, %s1279_s3 }
 0x84d   :  { %v440_v12 = vpop.permute.xlu1 %439 }
 0x84e   :  { %1111 = vmatmul.mubr.msk.f32.vlgmr.msra.gmra.mrb[4].mxu0 %vm125_vm3, %v440_v12 }
 0x84f   :  { %1189 = vmatpush3.bf16.msra.mxu0 %v1326_v4  ;;  %1132 = vmatprep.mubr.msk.f32.mxu0 %vm1276_vm2, %v1277_v8 }
 0x850   :  { %1190 = vmatprep.subr.bf16.mxu0 %v1275_v0 }
 0x853   :  { %1192 = vmatpush3.bf16.msra.mxu0 %v1347_v10 }
 0x854   :  { %1199 = vmatprep.subr.bf16.mxu0 %v1275_v0 }
 0x921   :  { %v509_v14 = vpop.f32.mrb[4].mxu0 }
 0x922   :  { %v514_v16 = vrot.slane %v509_v14, 2  ;;  %v1112_v17 = vpop.f32.mrb[5].mxu0 }
 0x924   :  { %v516_v18 = vadd.f32 %v514_v16, %v1371_v15 }
 0x926   :  { %1235 = vtanh.f32 %v516_v18  ;;  %v1010_v20 = vmul.f32 -1.442695, %v516_v18 }
 0x928   :  { %1237 = vpow2.f32 %v1010_v20 }
 0x930   :  { %v1236_v19 = vpop.eup %1235 }
 0x931   :  { %529 = vrot.lane.b32.xlu0 %v1236_v19, %s1278_s10 }
 0x932   :  { %v1238_v21 = vpop.eup %1237 }
 0x933   :  { %v520_v22 = vadd.f32 1.0, %v1238_v21 }
 0x935   :  { %1239 = vrcp.f32 %v520_v22 }
 0x93f   :  { %v1240_v23 = vpop.eup %1239 }
 0x940   :  { %v527_v27 = vmul.f32 %v1240_v23, %v525_v26 }
 0x9a3   :  { %v530_v24 = vpop.permute.xlu0 %529 }
 0x9a4   :  { %v532_v25 = vmul.f32 %v1240_v23, %v530_v24 }
 0x9a6   :  { %534 = vrot.lane.b32.xlu1 %v532_v25, %s1279_s3 }
 0xa18   :  { %v535_v28 = vpop.permute.xlu1 %534 }
 0xa19   :  { %v537_v29 = vadd.f32 %v535_v28, %v527_v27 }
 0xa1b   :  { %1241 = vtanh.f32 %v537_v29  ;;  %v629_v44 = vrot.slane %v537_v29, 6 }
 0xa25   :  { %v1242_v15 = vpop.eup %1241 }
 0xa26   :  { %540 = vrot.lane.b32.xlu0 %v1242_v15, %s1278_s10 }
 0xa98   :  { %v541_v30 = vpop.permute.xlu0 %540 }
 0xa99   :  { %v543_v31 = vmul.f32 %v1240_v23, %v541_v30 }
 0xa9b   :  { %v545_v32 = vrot.slane %v543_v31, 6 }
 0xa9d   :  { %546 = vrot.lane.b32.xlu1 %v545_v32, %s1279_s3 }
 0xb0f   :  { %v547_v33 = vpop.permute.xlu1 %546 }
 0xb10   :  { %1122 = vmatmul.mubr.msk.f32.vlgmr.msra.gmra.mrb[4].mxu1 %vm125_vm3, %v547_v33 }
 0xb11   :  { %1195 = vmatpush3.bf16.msra.mxu1 %v1326_v4  ;;  %1143 = vmatprep.mubr.msk.f32.mxu1 %vm1276_vm2, %v1277_v8 }
 0xb12   :  { %1196 = vmatprep.subr.bf16.mxu1 %v1275_v0 }
 0xb15   :  { %1198 = vmatpush3.bf16.msra.mxu1 %v1347_v10 }
 0xbe3   :  { %v616_v34 = vpop.f32.mrb[4].mxu1 }
 0xbe4   :  { %v620_v35 = vadd.f32 %v616_v34, %v1369_v13  ;;  %v1123_v36 = vpop.f32.mrb[5].mxu1 }
 0xbe6   :  { %1243 = vtanh.f32 %v620_v35  ;;  %v1012_v38 = vmul.f32 -1.442695, %v620_v35 }
 0xbe8   :  { %1245 = vpow2.f32 %v1012_v38 }
 0xbf0   :  { %v1244_v37 = vpop.eup %1243 }
 0xbf1   :  { %633 = vrot.lane.b32.xlu0 %v1244_v37, %s1278_s10 }
 0xbf2   :  { %v1246_v39 = vpop.eup %1245 }
 0xbf3   :  { %v624_v40 = vadd.f32 1.0, %v1246_v39 }
 0xbf5   :  { %1247 = vrcp.f32 %v624_v40  ;;  %v1019_v40 = vld [vmem:[%s1461_s4] ss:$0 sm:$0xff] }
 0xbff   :  { %v1248_v41 = vpop.eup %1247 }
 0xc00   :  { %v631_v45 = vmul.f32 %v1248_v41, %v629_v44 }
 0xc63   :  { %v634_v42 = vpop.permute.xlu0 %633 }
 0xc64   :  { %v636_v43 = vmul.f32 %v1248_v41, %v634_v42 }
 0xc66   :  { %638 = vrot.lane.b32.xlu1 %v636_v43, %s1279_s3 }
 0xcd8   :  { %v639_v46 = vpop.permute.xlu1 %638 }
 0xcd9   :  { %v641_v47 = vadd.f32 %v639_v46, %v631_v45  ;;  %v11_v45 = vstv %s1462_s5 }
 0xcda   :  { %12 = vst [vmem:[#allocation2] sm:$0x1] %v11_v45 }
 0xcdb   :  { %1249 = vtanh.f32 %v641_v47 }
 0xce5   :  { %v1250_v48 = vpop.eup %1249 }
 0xce6   :  { %644 = vrot.lane.b32.xlu0 %v1250_v48, %s1278_s10 }
 0xd58   :  { %v645_v49 = vpop.permute.xlu0 %644 }
 0xd59   :  { %v647_v50 = vmul.f32 %v1248_v41, %v645_v49 }
 0xd5b   :  { %649 = vrot.lane.b32.xlu1 %v647_v50, %s1279_s3 }
 0xdcd   :  { %v650_v51 = vpop.permute.xlu1 %649 }
 0xdce   :  { %1133 = vmatmul.mubr.msk.f32.vlgmr.msra.gmra.mrb[6].mxu0 %vm125_vm3, %v650_v51 }
 0xdcf   :  { %1201 = vmatpush3.bf16.msra.mxu0 %v1326_v4  ;;  %1154 = vmatprep.mubr.msk.f32.mxu0 %vm1276_vm2, %v1277_v8 }
 0xdd0   :  { %1202 = vmatprep.subr.bf16.mxu0 %v1275_v0  ;;  %v735_v0 = vrot.slane %v641_v47, 6 }
 0xdd3   :  { %1204 = vmatpush3.bf16.msra.mxu0 %v1347_v10 }
 0xea1   :  { %v719_v52 = vpop.f32.mrb[6].mxu0 }
 0xea2   :  { %v724_v53 = vrot.slane %v719_v52, 6  ;;  %v1134_v54 = vpop.f32.mrb[7].mxu0  ;;  %v1020_v52 = vld [vmem:[#allocation2] ss:$0 sm:$0xff] }
 0xea4   :  { %v726_v55 = vadd.f32 %v724_v53, %v1369_v13 }
 0xea6   :  { %1251 = vtanh.f32 %v726_v55  ;;  %v1014_v57 = vmul.f32 -1.442695, %v726_v55 }
 0xea8   :  { %1253 = vpow2.f32 %v1014_v57 }
 0xeb0   :  { %v1252_v56 = vpop.eup %1251 }
 0xeb1   :  { %739 = vrot.lane.b32.xlu0 %v1252_v56, %s1278_s10 }
 0xeb2   :  { %v1254_v58 = vpop.eup %1253 }
 0xeb3   :  { %v730_v4 = vadd.f32 1.0, %v1254_v58 }
 0xeb5   :  { %1255 = vrcp.f32 %v730_v4 }
 0xebf   :  { %v1256_v59 = vpop.eup %1255 }
 0xec0   :  { %v737_v10 = vmul.f32 %v1256_v59, %v735_v0 }
 0xf23   :  { %v740_v8 = vpop.permute.xlu0 %739 }
 0xf24   :  { %v742_v60 = vmul.f32 %v1256_v59, %v740_v8 }
 0xf26   :  { %744 = vrot.lane.b32.xlu1 %v742_v60, %s1279_s3 }
 0xf98   :  { %v745_v61 = vpop.permute.xlu1 %744 }
 0xf99   :  { %v747_v62 = vadd.f32 %v745_v61, %v737_v10 }
 0xf9b   :  { %1257 = vtanh.f32 %v747_v62  ;;  %v842_v21 = vrot.slane %v747_v62, 6 }
 0xfa5   :  { %v1258_v63 = vpop.eup %1257 }
 0xfa6   :  { %750 = vrot.lane.b32.xlu0 %v1258_v63, %s1278_s10 }
0x1018   :  { %v751_v1 = vpop.permute.xlu0 %750 }
0x1019   :  { %v753_v2 = vmul.f32 %v1256_v59, %v751_v1 }
0x101b   :  { %v755_v3 = vrot.slane %v753_v2, 2 }
0x101d   :  { %756 = vrot.lane.b32.xlu1 %v755_v3, %s1279_s3 }
0x108f   :  { %v757_v5 = vpop.permute.xlu1 %756 }
0x1090   :  { %1144 = vmatmul.mubr.msk.f32.vlgmr.msra.gmra.mrb[6].mxu1 %vm125_vm3, %v757_v5 }
0x1163   :  { %v826_v6 = vpop.f32.mrb[6].mxu1 }
0x1164   :  { %v831_v7 = vrot.slane %v826_v6, 4  ;;  %v1145_v9 = vpop.f32.mrb[7].mxu1 }
0x1166   :  { %v833_v11 = vadd.f32 %v831_v7, %v1369_v13 }
0x1168   :  { %1259 = vtanh.f32 %v833_v11  ;;  %v1016_v14 = vmul.f32 -1.442695, %v833_v11 }
0x116a   :  { %1261 = vpow2.f32 %v1016_v14 }
0x1172   :  { %v1260_v12 = vpop.eup %1259 }
0x1173   :  { %846 = vrot.lane.b32.xlu0 %v1260_v12, %s1278_s10 }
0x1174   :  { %v1262_v16 = vpop.eup %1261 }
0x1175   :  { %v837_v17 = vadd.f32 1.0, %v1262_v16 }
0x1177   :  { %1263 = vrcp.f32 %v837_v17 }
0x1181   :  { %v1264_v18 = vpop.eup %1263 }
0x1182   :  { %v844_v22 = vmul.f32 %v1264_v18, %v842_v21 }
0x11e5   :  { %v847_v19 = vpop.permute.xlu0 %846 }
0x11e6   :  { %v849_v20 = vmul.f32 %v1264_v18, %v847_v19 }
0x11e8   :  { %851 = vrot.lane.b32.xlu1 %v849_v20, %s1279_s3 }
0x125a   :  { %v852_v23 = vpop.permute.xlu1 %851 }
0x125b   :  { %v854_v24 = vadd.f32 %v852_v23, %v844_v22 }
0x125d   :  { %1265 = vtanh.f32 %v854_v24 }
0x1267   :  { %v1266_v25 = vpop.eup %1265 }
0x1268   :  { %857 = vrot.lane.b32.xlu0 %v1266_v25, %s1278_s10 }
0x12da   :  { %v858_v26 = vpop.permute.xlu0 %857 }
0x12db   :  { %v860_v27 = vmul.f32 %v1264_v18, %v858_v26 }
0x12dd   :  { %v862_v28 = vrot.slane %v860_v27, 4 }
0x12df   :  { %863 = vrot.lane.b32.xlu1 %v862_v28, %s1279_s3 }
0x1351   :  { %v864_v29 = vpop.permute.xlu1 %863 }
0x1352   :  { %1155 = vmatmul.mubr.msk.f32.vlgmr.msra.gmra.mrb[8].mxu0 %vm125_vm3, %v864_v29 }
0x1425   :  { %v933_v15 = vpop.f32.mrb[8].mxu0 }
0x1426   :  { %v938_v30 = vrot.slane %v933_v15, 2  ;;  %v1156_v31 = vpop.f32.mrb[9].mxu0 }
0x1428   :  { %v940_v32 = vadd.f32 %v938_v30, %v1369_v13  ;;  %v949_v13 = vrot.slane %v854_v24, 6 }
0x142a   :  { %1267 = vtanh.f32 %v940_v32  ;;  %v1018_v34 = vmul.f32 -1.442695, %v940_v32 }
0x142c   :  { %1269 = vpow2.f32 %v1018_v34 }
0x1434   :  { %v1268_v33 = vpop.eup %1267 }
0x1435   :  { %953 = vrot.lane.b32.xlu0 %v1268_v33, %s1278_s10 }
0x1436   :  { %v1270_v35 = vpop.eup %1269 }
0x1437   :  { %v944_v36 = vadd.f32 1.0, %v1270_v35 }
0x1439   :  { %1271 = vrcp.f32 %v944_v36 }
0x1443   :  { %v1272_v37 = vpop.eup %1271 }
0x1444   :  { %v951_v41 = vmul.f32 %v1272_v37, %v949_v13 }
0x14a7   :  { %v954_v38 = vpop.permute.xlu0 %953 }
0x14a8   :  { %v956_v39 = vmul.f32 %v1272_v37, %v954_v38 }
0x14aa   :  { %958 = vrot.lane.b32.xlu1 %v956_v39, %s1279_s3 }
0x14ae   :  { %974 = vrot.lane.b32.xlu1 %v1019_v40, %s1280_s13 }
0x151c   :  { %v959_v42 = vpop.permute.xlu1 %958 }
0x151d   :  { %v961_v43 = vadd.f32 %v959_v42, %v951_v41 }
0x151f   :  { %1273 = vtanh.f32 %v961_v43 }
0x1520   :  { %v975_v47 = vpop.permute.xlu1 %974 }
0x1529   :  { %v1274_v44 = vpop.eup %1273 }
0x152a   :  { %964 = vrot.lane.b32.xlu0 %v1274_v44, %s1278_s10 }
0x159c   :  { %v965_v46 = vpop.permute.xlu0 %964 }
0x159d   :  { %v967_v48 = vmul.f32 %v1272_v37, %v965_v46 }
0x159f   :  { %v977_v49 = vmul.f32 %v975_v47, %v967_v48 }
0x15a1   :  { %979 = vrot.lane.b32.xlu0 %v977_v49, %s1279_s3 }
0x1613   :  { %v980_v50 = vpop.permute.xlu0 %979 }
0x1614   :  { %v983_v51 = vsel %vm982_vm4, %v980_v50, 0.0 }
0x1615   :  { %984 = vadd.xlane.f32.xlu1 %v983_v51 }
0x16a2   :  { %v985_v53 = vpop.xlane.xlu1 %984 }
0x16a3   :  { %v993_v54 = vadd.f32 %v1020_v52, %v985_v53 }
0x16a5   :  { %995 = vst.msk [vmem:[%s1463_s6 - $0x6] sm:$0xc0] %vm994_vm5, %v993_v54 }

</bundles_post_ra>
